<compile_context>
chip_gen: v7x
topology: tpu7x:2x2x1
jax: 0.10.0
libtpu: 0.0.40
codegen_flags: <defaults>
</compile_context>

<pallas_src>
import functools

import jax
import jax.numpy as jnp
from jax.experimental import pallas as pl
from jax.experimental.pallas import tpu as pltpu

BN_EPS = 1e-5


def _gated_res_block_kernel(xb_ref, wvf_ref, wvg_ref, yf_ref, yg_ref, xres_ref,
                            out_ref, *, C, ph, dws, inv_count):
    """Single invocation; all operands resident in VMEM, lane-dense.

    Column layout: col = n*(W*C) + w*C + c   (lane width L = N*W*C = 128).

    xb_ref  : (Cin*(H+ph), L)  per-input-channel band: ph zero rows, then H
                               rows of x[n, ci, h, w] broadcast over c.
    wvf_ref : (Cin*T, L)       f-half weight row per causal tap (w-edge mask
                               folded in; zero outside valid w).
    wvg_ref : (Cin*T, L)       g-half weight rows.
    yf_ref  : (1, L)           class embedding + linear bias + conv bias (f).
    yg_ref  : (1, L)           same for the g half.
    xres_ref: (H, L)           residual input in the output slab layout.
    out_ref : (H, L)
    """
    H, L = out_ref.shape
    band = H + ph
    cin = xb_ref.shape[0] // band
    n_taps = len(dws)
    dh_set = sorted({dh for dh, _ in dws})

    # --- masked ('B') conv: dense full-vreg VPU FMAs -------------------------
    accf_parts, accg_parts = [], []
    for ci in range(cin):
        # kh shifts: sublane slices of this channel's zero-top-padded band.
        base = {dh: xb_ref[pl.ds(ci * band + ph + dh, H), :] for dh in dh_set}
        pf = pg = None
        for k, (dh, dw) in enumerate(dws):
            b = base[dh]
            # kw shift: lane rotation by a multiple of C (XLU, overlaps with
            # the VPU MACs).  Lanes that wrapped across a w / n / array
            # boundary carry garbage, but the matching weight row is zero
            # there, so no in-loop masks are needed.
            s = b if dw == 0 else pltpu.roll(b, shift=(-dw * C) % L, axis=1)
            t = ci * n_taps + k
            # (1, L) weight rows; the sublane splat to (H, L) is 1 op per tap
            # and off the binding slot at H = 16 (pre-replicated tiles or a
            # stride-0 sublane-broadcast load would remove it for larger H).
            wf = wvf_ref[pl.ds(t, 1), :]
            wg = wvg_ref[pl.ds(t, 1), :]
            if pf is None:
                pf, pg = s * wf, s * wg
            else:
                pf, pg = pf + s * wf, pg + s * wg
        accf_parts.append(pf)
        accg_parts.append(pg)

    # Pairwise tree-sum keeps every accumulation chain short (5 + log2(Cin))
    # so the MAC phase can fill the 4 VALU slots instead of serializing on
    # one 20-deep dependent add chain.
    def _tree_sum(parts):
        while len(parts) > 1:
            nxt = [parts[i] + parts[i + 1] for i in range(0, len(parts) - 1, 2)]
            if len(parts) % 2:
                nxt.append(parts[-1])
            parts = nxt
        return parts[0]

    # Class-conditional embedding + (linear + conv) biases: pre-folded rows.
    x1f = _tree_sum(accf_parts) + yf_ref[...]                 # (H, L)
    x1g = _tree_sum(accg_parts) + yg_ref[...]

    # --- gating (exact f32; exp / tanh on the EUP) ---------------------------
    f = jnp.tanh(x1f)
    g = pl.reciprocal(1.0 + jnp.exp(-x1g), approx=False)
    h = f * g                                                 # (H, L)

    # --- BatchNorm2d, training-mode batch stats (gamma=1, beta=0) ------------
    # Single pass: sublane-reduce h and h^2 to one row, then an exact-f32
    # roll-and-add reduce over the N*W lane groups, which leaves the
    # per-channel totals broadcast to every lane.  (Replaces v2's 64 KiB gmat
    # constant and its default-precision bf16 MXU dots.)
    s1 = jnp.sum(h, axis=0, keepdims=True)                    # (1, L)
    s2 = jnp.sum(h * h, axis=0, keepdims=True)
    step = C
    while step < L:                                           # log2(N*W) steps
        s1 = s1 + pltpu.roll(s1, shift=step, axis=1)
        s2 = s2 + pltpu.roll(s2, shift=step, axis=1)
        step *= 2
    mean = s1 * inv_count
    # var = E[h^2] - mean^2 is safe here: h = tanh*sigmoid is bounded in (-1,1).
    var = s2 * inv_count - mean * mean
    inv_std = jax.lax.rsqrt(var + BN_EPS)

    # Residual (identity shortcut); (16, 128) slab -> dense unmasked stores.
    out_ref[...] = xres_ref[...] + (h - mean) * inv_std


def _mask_b(wshape):
    """PixelCNN mask 'B' for an OIHW weight of shape (O, I, KH, KW)."""
    O, I, KH, KW = wshape
    m = jnp.ones((O, I, KH, KW), jnp.float32)
    m = m.at[:, :, KH // 2, KW // 2 + 1:].set(0.0)
    m = m.at[:, :, KH // 2 + 1:, :].set(0.0)
    return m


def gated_res_block(x_nchw, y, params):
    """x_nchw: (N, Cin, H, W) f32, y: (N, n_classes) f32 -> (N, Cout, H, W)."""
    N, Cin, H, W = x_nchw.shape
    w_conv = params["w_conv"]                 # (2*Cout, Cin, KH, KW), OIHW
    b_conv = params["b_conv"]                 # (2*Cout,)
    w_y = params["w_y"]                       # (2*Cout, n_classes)
    b_y = params["b_y"]                       # (2*Cout,)
    C2, Cin_w, KH, KW = w_conv.shape
    C = C2 // 2
    assert Cin == C, "identity-shortcut configuration requires in_channels == out_channels"
    assert Cin_w == Cin

    ph, pw = KH // 2, KW // 2
    L = N * W * C                              # output slab lane width (128 here)
    assert L % 128 == 0, "keep the output lane dim a multiple of 128 (dense vst)"
    assert (N * W) & (N * W - 1) == 0, "BN roll-reduce assumes N*W is a power of two"

    # Causal taps kept by mask 'B' (weights outside this set are zero anyway).
    taps = [(kh, kw) for kh in range(KH // 2) for kw in range(KW)]
    taps += [(KH // 2, kw) for kw in range(KW // 2 + 1)]
    dws = tuple((kh - ph, kw - pw) for (kh, kw) in taps)
    assert all(dh <= 0 and ph + dh >= 0 for dh, _ in dws)

    wm = w_conv * _mask_b(w_conv.shape)        # (2C, Cin, KH, KW)

    # ---- layout plumbing (small, trace-time XLA) ----------------------------
    # Input slab: one (ph zero rows + H rows) band per input channel, value
    # broadcast across the C output-channel lanes of each (n, w) group:
    #   xb[ci*(H+ph) + ph + h, n*W*C + w*C + c] = x[n, ci, h, w]
    # The kernel derives every causal tap from this single copy, so no per-tap
    # expansion of x exists anywhere (v2 shipped a ~40x pre-expanded xe).
    # The remaining ci -> output-lane broadcast is a factor C = 4; at
    # production channel counts the conv should become an im2col MXU matmul.
    # TODO(synk): im2col MXU path for C >= ~32-64 (per review).
    x_cihnw = jnp.transpose(x_nchw, (1, 2, 0, 3))             # (Cin, H, N, W)
    xb = jnp.broadcast_to(x_cihnw[..., None], (Cin, H, N, W, C)).reshape(Cin, H, L)
    xb = jnp.pad(xb, ((0, 0), (ph, 0), (0, 0))).reshape(Cin * (H + ph), L)

    # Per-tap weight rows: value varies only with the output-channel lane and
    # the w-edge validity of the tap (zero where w+dw falls outside [0, W)).
    # These depend only on the conv weights, so a production caller can cache
    # them across calls.
    lane = jnp.arange(L)
    lane_c = lane % C
    lane_w = (lane // C) % W
    wvf_rows, wvg_rows = [], []
    for ci in range(Cin):
        for (kh, kw) in taps:
            dw = kw - pw
            valid = ((lane_w + dw >= 0) & (lane_w + dw <= W - 1)).astype(jnp.float32)
            wvf_rows.append(jnp.take(wm[:C, ci, kh, kw], lane_c) * valid)
            wvg_rows.append(jnp.take(wm[C:, ci, kh, kw], lane_c) * valid)
    wvf = jnp.stack(wvf_rows)                                  # (Cin*T, L)
    wvg = jnp.stack(wvg_rows)

    # Class embedding + linear bias + conv bias folded into two (1, L) rows
    # (exact f32; keeps the tiny (N, ncls) x (ncls, 2C) product out of the
    # kernel and off the MXU, and removes v2's lane-sparse y_aug operand).
    ye = jnp.dot(y, w_y.T, precision=jax.lax.Precision.HIGHEST) + b_y + b_conv
    yrows = jnp.transpose(ye.reshape(N, 2, C), (1, 0, 2))      # (2, N, C)
    yrows = jnp.broadcast_to(yrows[:, :, None, :], (2, N, W, C)).reshape(2, 1, L)
    yrow_f, yrow_g = yrows[0], yrows[1]                        # (1, L) each

    # Residual input in the output slab layout (col = n*W*C + w*C + c).
    xres = jnp.transpose(x_nchw, (2, 0, 3, 1)).reshape(H, L)

    kernel = functools.partial(
        _gated_res_block_kernel,
        C=C, ph=ph, dws=dws, inv_count=1.0 / float(N * H * W))

    # TODO(synk): at production PixelCNN shapes, grid this over (N, H)-tiles
    #             with dimension_semantics=("parallel", ...) so both v7x
    #             TensorCores are used, compute per-tile BN sum/sumsq partials
    #             with a second normalization pass, keep output blocks >= 128
    #             lanes, and size tiles against v7x's 64 MiB VMEM accounting
    #             for BlockSpec double-buffering (vmem_limit_bytes if raised).
    #             The single whole-array invocation is only for this config.
    out2d = pl.pallas_call(
        kernel,
        out_shape=jax.ShapeDtypeStruct((H, L), jnp.float32),
        in_specs=[pl.BlockSpec(memory_space=pltpu.MemorySpace.VMEM)] * 6,
        out_specs=pl.BlockSpec(memory_space=pltpu.MemorySpace.VMEM),
    )(xb, wvf, wvg, yrow_f, yrow_g, xres)

    # Unfold the lane-dense slab back to NCHW.
    return jnp.transpose(out2d.reshape(H, N, W, C), (1, 3, 0, 2))


def _reference(x_nchw, y, params):
    """Pure-JAX reference, NCHW (mirrors the PyTorch forward)."""
    w = params["w_conv"] * _mask_b(params["w_conv"].shape)
    C2 = w.shape[0]
    C = C2 // 2
    kh, kw = w.shape[2], w.shape[3]
    x1 = jax.lax.conv_general_dilated(
        x_nchw, w, (1, 1), ((kh // 2, kh // 2), (kw // 2, kw // 2)),
        dimension_numbers=("NCHW", "OIHW", "NCHW"),
        precision=jax.lax.Precision.HIGHEST)
    x1 = x1 + params["b_conv"].reshape(1, C2, 1, 1)
    ye = jnp.dot(y, params["w_y"].T, precision=jax.lax.Precision.HIGHEST) + params["b_y"]
    ye = ye[:, :, None, None]
    f = jnp.tanh(x1[:, :C] + ye[:, :C])
    g = jax.nn.sigmoid(x1[:, C:] + ye[:, C:])
    h = g * f
    mean = h.mean(axis=(0, 2, 3), keepdims=True)
    var = ((h - mean) ** 2).mean(axis=(0, 2, 3), keepdims=True)
    return x_nchw + (h - mean) / jnp.sqrt(var + BN_EPS)


if __name__ == "__main__":
    # Small deterministic configuration consistent with the module.
    N, C_IN, C_OUT, H, W = 2, 4, 4, 16, 16
    N_CLASSES, KS = 10, 3

    key = jax.random.PRNGKey(0)
    kx, ky, kw1, kb1, kw2, kb2 = jax.random.split(key, 6)

    x = jax.random.normal(kx, (N, C_IN, H, W), jnp.float32)
    y = jax.random.normal(ky, (N, N_CLASSES), jnp.float32)

    params = {
        "w_conv": 0.1 * jax.random.normal(kw1, (2 * C_OUT, C_IN, KS, KS), jnp.float32),
        "b_conv": 0.1 * jax.random.normal(kb1, (2 * C_OUT,), jnp.float32),
        "w_y": 0.1 * jax.random.normal(kw2, (2 * C_OUT, N_CLASSES), jnp.float32),
        "b_y": 0.1 * jax.random.normal(kb2, (2 * C_OUT,), jnp.float32),
    }

    out = jax.jit(gated_res_block)(x, y, params)
    out = jax.block_until_ready(out)

    ref = _reference(x, y, params)
    assert out.shape == (N, C_OUT, H, W)
    assert bool(jnp.all(jnp.isfinite(out)))
    # Everything in-kernel is exact f32 (no bf16 MXU passes anymore), so the
    # tolerance is tightened from v2's 2e-3 to 1e-4 (residual differences come
    # only from summation order and transcendental implementations).
    assert bool(jnp.allclose(out, ref, atol=1e-4, rtol=1e-4)), "mismatch vs JAX reference"

    print("KERNEL_OK")
</pallas_src>

<mosaic_0001>
module attributes {stable_mosaic.version = 11 : i64} {
  func.func @_gated_res_block_kernel(%arg0: memref<68x128xf32, #tpu.memory_space<vmem>>, %arg1: memref<20x128xf32, #tpu.memory_space<vmem>>, %arg2: memref<20x128xf32, #tpu.memory_space<vmem>>, %arg3: memref<1x128xf32, #tpu.memory_space<vmem>>, %arg4: memref<1x128xf32, #tpu.memory_space<vmem>>, %arg5: memref<16x128xf32, #tpu.memory_space<vmem>>, %arg6: memref<16x128xf32, #tpu.memory_space<vmem>>) attributes {dimension_semantics = [], scalar_prefetch = 0 : i64, scratch_operands = 0 : i64, tpu.core_type = #tpu.core_type<tc>} {
    %c0 = arith.constant 0 : index
    %c0_0 = arith.constant 0 : index
    %0 = vector.load %arg0[%c0, %c0_0] : memref<68x128xf32, #tpu.memory_space<vmem>>, vector<16x128xf32>
    %c1 = arith.constant 1 : index
    %c0_1 = arith.constant 0 : index
    %1 = vector.load %arg0[%c1, %c0_1] : memref<68x128xf32, #tpu.memory_space<vmem>>, vector<16x128xf32>
    %c4_i32 = arith.constant 4 : i32
    %2 = tpu.dynamic_rotate %0 by %c4_i32 dim 1 : vector<16x128xf32>, i32 -> vector<16x128xf32>
    %c0_2 = arith.constant 0 : index
    %c0_3 = arith.constant 0 : index
    %3 = vector.load %arg1[%c0_2, %c0_3] : memref<20x128xf32, #tpu.memory_space<vmem>>, vector<1x128xf32>
    %c0_4 = arith.constant 0 : index
    %c0_5 = arith.constant 0 : index
    %4 = vector.load %arg2[%c0_4, %c0_5] : memref<20x128xf32, #tpu.memory_space<vmem>>, vector<1x128xf32>
    %5 = vector.broadcast %3 : vector<1x128xf32> to vector<16x128xf32>
    %6 = arith.mulf %2, %5 : vector<16x128xf32>
    %7 = vector.broadcast %4 : vector<1x128xf32> to vector<16x128xf32>
    %8 = arith.mulf %2, %7 : vector<16x128xf32>
    %c1_6 = arith.constant 1 : index
    %c0_7 = arith.constant 0 : index
    %9 = vector.load %arg1[%c1_6, %c0_7] : memref<20x128xf32, #tpu.memory_space<vmem>>, vector<1x128xf32>
    %c1_8 = arith.constant 1 : index
    %c0_9 = arith.constant 0 : index
    %10 = vector.load %arg2[%c1_8, %c0_9] : memref<20x128xf32, #tpu.memory_space<vmem>>, vector<1x128xf32>
    %11 = vector.broadcast %9 : vector<1x128xf32> to vector<16x128xf32>
    %12 = arith.mulf %0, %11 : vector<16x128xf32>
    %13 = arith.addf %6, %12 : vector<16x128xf32>
    %14 = vector.broadcast %10 : vector<1x128xf32> to vector<16x128xf32>
    %15 = arith.mulf %0, %14 : vector<16x128xf32>
    %16 = arith.addf %8, %15 : vector<16x128xf32>
    %c124_i32 = arith.constant 124 : i32
    %17 = tpu.dynamic_rotate %0 by %c124_i32 dim 1 : vector<16x128xf32>, i32 -> vector<16x128xf32>
    %c2 = arith.constant 2 : index
    %c0_10 = arith.constant 0 : index
    %18 = vector.load %arg1[%c2, %c0_10] : memref<20x128xf32, #tpu.memory_space<vmem>>, vector<1x128xf32>
    %c2_11 = arith.constant 2 : index
    %c0_12 = arith.constant 0 : index
    %19 = vector.load %arg2[%c2_11, %c0_12] : memref<20x128xf32, #tpu.memory_space<vmem>>, vector<1x128xf32>
    %20 = vector.broadcast %18 : vector<1x128xf32> to vector<16x128xf32>
    %21 = arith.mulf %17, %20 : vector<16x128xf32>
    %22 = arith.addf %13, %21 : vector<16x128xf32>
    %23 = vector.broadcast %19 : vector<1x128xf32> to vector<16x128xf32>
    %24 = arith.mulf %17, %23 : vector<16x128xf32>
    %25 = arith.addf %16, %24 : vector<16x128xf32>
    %c4_i32_13 = arith.constant 4 : i32
    %26 = tpu.dynamic_rotate %1 by %c4_i32_13 dim 1 : vector<16x128xf32>, i32 -> vector<16x128xf32>
    %c3 = arith.constant 3 : index
    %c0_14 = arith.constant 0 : index
    %27 = vector.load %arg1[%c3, %c0_14] : memref<20x128xf32, #tpu.memory_space<vmem>>, vector<1x128xf32>
    %c3_15 = arith.constant 3 : index
    %c0_16 = arith.constant 0 : index
    %28 = vector.load %arg2[%c3_15, %c0_16] : memref<20x128xf32, #tpu.memory_space<vmem>>, vector<1x128xf32>
    %29 = vector.broadcast %27 : vector<1x128xf32> to vector<16x128xf32>
    %30 = arith.mulf %26, %29 : vector<16x128xf32>
    %31 = arith.addf %22, %30 : vector<16x128xf32>
    %32 = vector.broadcast %28 : vector<1x128xf32> to vector<16x128xf32>
    %33 = arith.mulf %26, %32 : vector<16x128xf32>
    %34 = arith.addf %25, %33 : vector<16x128xf32>
    %c4 = arith.constant 4 : index
    %c0_17 = arith.constant 0 : index
    %35 = vector.load %arg1[%c4, %c0_17] : memref<20x128xf32, #tpu.memory_space<vmem>>, vector<1x128xf32>
    %c4_18 = arith.constant 4 : index
    %c0_19 = arith.constant 0 : index
    %36 = vector.load %arg2[%c4_18, %c0_19] : memref<20x128xf32, #tpu.memory_space<vmem>>, vector<1x128xf32>
    %37 = vector.broadcast %35 : vector<1x128xf32> to vector<16x128xf32>
    %38 = arith.mulf %1, %37 : vector<16x128xf32>
    %39 = arith.addf %31, %38 : vector<16x128xf32>
    %40 = vector.broadcast %36 : vector<1x128xf32> to vector<16x128xf32>
    %41 = arith.mulf %1, %40 : vector<16x128xf32>
    %42 = arith.addf %34, %41 : vector<16x128xf32>
    %c17 = arith.constant 17 : index
    %c0_20 = arith.constant 0 : index
    %43 = vector.load %arg0[%c17, %c0_20] : memref<68x128xf32, #tpu.memory_space<vmem>>, vector<16x128xf32>
    %c18 = arith.constant 18 : index
    %c0_21 = arith.constant 0 : index
    %44 = vector.load %arg0[%c18, %c0_21] : memref<68x128xf32, #tpu.memory_space<vmem>>, vector<16x128xf32>
    %c4_i32_22 = arith.constant 4 : i32
    %45 = tpu.dynamic_rotate %43 by %c4_i32_22 dim 1 : vector<16x128xf32>, i32 -> vector<16x128xf32>
    %c5 = arith.constant 5 : index
    %c0_23 = arith.constant 0 : index
    %46 = vector.load %arg1[%c5, %c0_23] : memref<20x128xf32, #tpu.memory_space<vmem>>, vector<1x128xf32>
    %c5_24 = arith.constant 5 : index
    %c0_25 = arith.constant 0 : index
    %47 = vector.load %arg2[%c5_24, %c0_25] : memref<20x128xf32, #tpu.memory_space<vmem>>, vector<1x128xf32>
    %48 = vector.broadcast %46 : vector<1x128xf32> to vector<16x128xf32>
    %49 = arith.mulf %45, %48 : vector<16x128xf32>
    %50 = vector.broadcast %47 : vector<1x128xf32> to vector<16x128xf32>
    %51 = arith.mulf %45, %50 : vector<16x128xf32>
    %c6 = arith.constant 6 : index
    %c0_26 = arith.constant 0 : index
    %52 = vector.load %arg1[%c6, %c0_26] : memref<20x128xf32, #tpu.memory_space<vmem>>, vector<1x128xf32>
    %c6_27 = arith.constant 6 : index
    %c0_28 = arith.constant 0 : index
    %53 = vector.load %arg2[%c6_27, %c0_28] : memref<20x128xf32, #tpu.memory_space<vmem>>, vector<1x128xf32>
    %54 = vector.broadcast %52 : vector<1x128xf32> to vector<16x128xf32>
    %55 = arith.mulf %43, %54 : vector<16x128xf32>
    %56 = arith.addf %49, %55 : vector<16x128xf32>
    %57 = vector.broadcast %53 : vector<1x128xf32> to vector<16x128xf32>
    %58 = arith.mulf %43, %57 : vector<16x128xf32>
    %59 = arith.addf %51, %58 : vector<16x128xf32>
    %c124_i32_29 = arith.constant 124 : i32
    %60 = tpu.dynamic_rotate %43 by %c124_i32_29 dim 1 : vector<16x128xf32>, i32 -> vector<16x128xf32>
    %c7 = arith.constant 7 : index
    %c0_30 = arith.constant 0 : index
    %61 = vector.load %arg1[%c7, %c0_30] : memref<20x128xf32, #tpu.memory_space<vmem>>, vector<1x128xf32>
    %c7_31 = arith.constant 7 : index
    %c0_32 = arith.constant 0 : index
    %62 = vector.load %arg2[%c7_31, %c0_32] : memref<20x128xf32, #tpu.memory_space<vmem>>, vector<1x128xf32>
    %63 = vector.broadcast %61 : vector<1x128xf32> to vector<16x128xf32>
    %64 = arith.mulf %60, %63 : vector<16x128xf32>
    %65 = arith.addf %56, %64 : vector<16x128xf32>
    %66 = vector.broadcast %62 : vector<1x128xf32> to vector<16x128xf32>
    %67 = arith.mulf %60, %66 : vector<16x128xf32>
    %68 = arith.addf %59, %67 : vector<16x128xf32>
    %c4_i32_33 = arith.constant 4 : i32
    %69 = tpu.dynamic_rotate %44 by %c4_i32_33 dim 1 : vector<16x128xf32>, i32 -> vector<16x128xf32>
    %c8 = arith.constant 8 : index
    %c0_34 = arith.constant 0 : index
    %70 = vector.load %arg1[%c8, %c0_34] : memref<20x128xf32, #tpu.memory_space<vmem>>, vector<1x128xf32>
    %c8_35 = arith.constant 8 : index
    %c0_36 = arith.constant 0 : index
    %71 = vector.load %arg2[%c8_35, %c0_36] : memref<20x128xf32, #tpu.memory_space<vmem>>, vector<1x128xf32>
    %72 = vector.broadcast %70 : vector<1x128xf32> to vector<16x128xf32>
    %73 = arith.mulf %69, %72 : vector<16x128xf32>
    %74 = arith.addf %65, %73 : vector<16x128xf32>
    %75 = vector.broadcast %71 : vector<1x128xf32> to vector<16x128xf32>
    %76 = arith.mulf %69, %75 : vector<16x128xf32>
    %77 = arith.addf %68, %76 : vector<16x128xf32>
    %c9 = arith.constant 9 : index
    %c0_37 = arith.constant 0 : index
    %78 = vector.load %arg1[%c9, %c0_37] : memref<20x128xf32, #tpu.memory_space<vmem>>, vector<1x128xf32>
    %c9_38 = arith.constant 9 : index
    %c0_39 = arith.constant 0 : index
    %79 = vector.load %arg2[%c9_38, %c0_39] : memref<20x128xf32, #tpu.memory_space<vmem>>, vector<1x128xf32>
    %80 = vector.broadcast %78 : vector<1x128xf32> to vector<16x128xf32>
    %81 = arith.mulf %44, %80 : vector<16x128xf32>
    %82 = arith.addf %74, %81 : vector<16x128xf32>
    %83 = vector.broadcast %79 : vector<1x128xf32> to vector<16x128xf32>
    %84 = arith.mulf %44, %83 : vector<16x128xf32>
    %85 = arith.addf %77, %84 : vector<16x128xf32>
    %c34 = arith.constant 34 : index
    %c0_40 = arith.constant 0 : index
    %86 = vector.load %arg0[%c34, %c0_40] : memref<68x128xf32, #tpu.memory_space<vmem>>, vector<16x128xf32>
    %c35 = arith.constant 35 : index
    %c0_41 = arith.constant 0 : index
    %87 = vector.load %arg0[%c35, %c0_41] : memref<68x128xf32, #tpu.memory_space<vmem>>, vector<16x128xf32>
    %c4_i32_42 = arith.constant 4 : i32
    %88 = tpu.dynamic_rotate %86 by %c4_i32_42 dim 1 : vector<16x128xf32>, i32 -> vector<16x128xf32>
    %c10 = arith.constant 10 : index
    %c0_43 = arith.constant 0 : index
    %89 = vector.load %arg1[%c10, %c0_43] : memref<20x128xf32, #tpu.memory_space<vmem>>, vector<1x128xf32>
    %c10_44 = arith.constant 10 : index
    %c0_45 = arith.constant 0 : index
    %90 = vector.load %arg2[%c10_44, %c0_45] : memref<20x128xf32, #tpu.memory_space<vmem>>, vector<1x128xf32>
    %91 = vector.broadcast %89 : vector<1x128xf32> to vector<16x128xf32>
    %92 = arith.mulf %88, %91 : vector<16x128xf32>
    %93 = vector.broadcast %90 : vector<1x128xf32> to vector<16x128xf32>
    %94 = arith.mulf %88, %93 : vector<16x128xf32>
    %c11 = arith.constant 11 : index
    %c0_46 = arith.constant 0 : index
    %95 = vector.load %arg1[%c11, %c0_46] : memref<20x128xf32, #tpu.memory_space<vmem>>, vector<1x128xf32>
    %c11_47 = arith.constant 11 : index
    %c0_48 = arith.constant 0 : index
    %96 = vector.load %arg2[%c11_47, %c0_48] : memref<20x128xf32, #tpu.memory_space<vmem>>, vector<1x128xf32>
    %97 = vector.broadcast %95 : vector<1x128xf32> to vector<16x128xf32>
    %98 = arith.mulf %86, %97 : vector<16x128xf32>
    %99 = arith.addf %92, %98 : vector<16x128xf32>
    %100 = vector.broadcast %96 : vector<1x128xf32> to vector<16x128xf32>
    %101 = arith.mulf %86, %100 : vector<16x128xf32>
    %102 = arith.addf %94, %101 : vector<16x128xf32>
    %c124_i32_49 = arith.constant 124 : i32
    %103 = tpu.dynamic_rotate %86 by %c124_i32_49 dim 1 : vector<16x128xf32>, i32 -> vector<16x128xf32>
    %c12 = arith.constant 12 : index
    %c0_50 = arith.constant 0 : index
    %104 = vector.load %arg1[%c12, %c0_50] : memref<20x128xf32, #tpu.memory_space<vmem>>, vector<1x128xf32>
    %c12_51 = arith.constant 12 : index
    %c0_52 = arith.constant 0 : index
    %105 = vector.load %arg2[%c12_51, %c0_52] : memref<20x128xf32, #tpu.memory_space<vmem>>, vector<1x128xf32>
    %106 = vector.broadcast %104 : vector<1x128xf32> to vector<16x128xf32>
    %107 = arith.mulf %103, %106 : vector<16x128xf32>
    %108 = arith.addf %99, %107 : vector<16x128xf32>
    %109 = vector.broadcast %105 : vector<1x128xf32> to vector<16x128xf32>
    %110 = arith.mulf %103, %109 : vector<16x128xf32>
    %111 = arith.addf %102, %110 : vector<16x128xf32>
    %c4_i32_53 = arith.constant 4 : i32
    %112 = tpu.dynamic_rotate %87 by %c4_i32_53 dim 1 : vector<16x128xf32>, i32 -> vector<16x128xf32>
    %c13 = arith.constant 13 : index
    %c0_54 = arith.constant 0 : index
    %113 = vector.load %arg1[%c13, %c0_54] : memref<20x128xf32, #tpu.memory_space<vmem>>, vector<1x128xf32>
    %c13_55 = arith.constant 13 : index
    %c0_56 = arith.constant 0 : index
    %114 = vector.load %arg2[%c13_55, %c0_56] : memref<20x128xf32, #tpu.memory_space<vmem>>, vector<1x128xf32>
    %115 = vector.broadcast %113 : vector<1x128xf32> to vector<16x128xf32>
    %116 = arith.mulf %112, %115 : vector<16x128xf32>
    %117 = arith.addf %108, %116 : vector<16x128xf32>
    %118 = vector.broadcast %114 : vector<1x128xf32> to vector<16x128xf32>
    %119 = arith.mulf %112, %118 : vector<16x128xf32>
    %120 = arith.addf %111, %119 : vector<16x128xf32>
    %c14 = arith.constant 14 : index
    %c0_57 = arith.constant 0 : index
    %121 = vector.load %arg1[%c14, %c0_57] : memref<20x128xf32, #tpu.memory_space<vmem>>, vector<1x128xf32>
    %c14_58 = arith.constant 14 : index
    %c0_59 = arith.constant 0 : index
    %122 = vector.load %arg2[%c14_58, %c0_59] : memref<20x128xf32, #tpu.memory_space<vmem>>, vector<1x128xf32>
    %123 = vector.broadcast %121 : vector<1x128xf32> to vector<16x128xf32>
    %124 = arith.mulf %87, %123 : vector<16x128xf32>
    %125 = arith.addf %117, %124 : vector<16x128xf32>
    %126 = vector.broadcast %122 : vector<1x128xf32> to vector<16x128xf32>
    %127 = arith.mulf %87, %126 : vector<16x128xf32>
    %128 = arith.addf %120, %127 : vector<16x128xf32>
    %c51 = arith.constant 51 : index
    %c0_60 = arith.constant 0 : index
    %129 = vector.load %arg0[%c51, %c0_60] : memref<68x128xf32, #tpu.memory_space<vmem>>, vector<16x128xf32>
    %c52 = arith.constant 52 : index
    %c0_61 = arith.constant 0 : index
    %130 = vector.load %arg0[%c52, %c0_61] : memref<68x128xf32, #tpu.memory_space<vmem>>, vector<16x128xf32>
    %c4_i32_62 = arith.constant 4 : i32
    %131 = tpu.dynamic_rotate %129 by %c4_i32_62 dim 1 : vector<16x128xf32>, i32 -> vector<16x128xf32>
    %c15 = arith.constant 15 : index
    %c0_63 = arith.constant 0 : index
    %132 = vector.load %arg1[%c15, %c0_63] : memref<20x128xf32, #tpu.memory_space<vmem>>, vector<1x128xf32>
    %c15_64 = arith.constant 15 : index
    %c0_65 = arith.constant 0 : index
    %133 = vector.load %arg2[%c15_64, %c0_65] : memref<20x128xf32, #tpu.memory_space<vmem>>, vector<1x128xf32>
    %134 = vector.broadcast %132 : vector<1x128xf32> to vector<16x128xf32>
    %135 = arith.mulf %131, %134 : vector<16x128xf32>
    %136 = vector.broadcast %133 : vector<1x128xf32> to vector<16x128xf32>
    %137 = arith.mulf %131, %136 : vector<16x128xf32>
    %c16 = arith.constant 16 : index
    %c0_66 = arith.constant 0 : index
    %138 = vector.load %arg1[%c16, %c0_66] : memref<20x128xf32, #tpu.memory_space<vmem>>, vector<1x128xf32>
    %c16_67 = arith.constant 16 : index
    %c0_68 = arith.constant 0 : index
    %139 = vector.load %arg2[%c16_67, %c0_68] : memref<20x128xf32, #tpu.memory_space<vmem>>, vector<1x128xf32>
    %140 = vector.broadcast %138 : vector<1x128xf32> to vector<16x128xf32>
    %141 = arith.mulf %129, %140 : vector<16x128xf32>
    %142 = arith.addf %135, %141 : vector<16x128xf32>
    %143 = vector.broadcast %139 : vector<1x128xf32> to vector<16x128xf32>
    %144 = arith.mulf %129, %143 : vector<16x128xf32>
    %145 = arith.addf %137, %144 : vector<16x128xf32>
    %c124_i32_69 = arith.constant 124 : i32
    %146 = tpu.dynamic_rotate %129 by %c124_i32_69 dim 1 : vector<16x128xf32>, i32 -> vector<16x128xf32>
    %c17_70 = arith.constant 17 : index
    %c0_71 = arith.constant 0 : index
    %147 = vector.load %arg1[%c17_70, %c0_71] : memref<20x128xf32, #tpu.memory_space<vmem>>, vector<1x128xf32>
    %c17_72 = arith.constant 17 : index
    %c0_73 = arith.constant 0 : index
    %148 = vector.load %arg2[%c17_72, %c0_73] : memref<20x128xf32, #tpu.memory_space<vmem>>, vector<1x128xf32>
    %149 = vector.broadcast %147 : vector<1x128xf32> to vector<16x128xf32>
    %150 = arith.mulf %146, %149 : vector<16x128xf32>
    %151 = arith.addf %142, %150 : vector<16x128xf32>
    %152 = vector.broadcast %148 : vector<1x128xf32> to vector<16x128xf32>
    %153 = arith.mulf %146, %152 : vector<16x128xf32>
    %154 = arith.addf %145, %153 : vector<16x128xf32>
    %c4_i32_74 = arith.constant 4 : i32
    %155 = tpu.dynamic_rotate %130 by %c4_i32_74 dim 1 : vector<16x128xf32>, i32 -> vector<16x128xf32>
    %c18_75 = arith.constant 18 : index
    %c0_76 = arith.constant 0 : index
    %156 = vector.load %arg1[%c18_75, %c0_76] : memref<20x128xf32, #tpu.memory_space<vmem>>, vector<1x128xf32>
    %c18_77 = arith.constant 18 : index
    %c0_78 = arith.constant 0 : index
    %157 = vector.load %arg2[%c18_77, %c0_78] : memref<20x128xf32, #tpu.memory_space<vmem>>, vector<1x128xf32>
    %158 = vector.broadcast %156 : vector<1x128xf32> to vector<16x128xf32>
    %159 = arith.mulf %155, %158 : vector<16x128xf32>
    %160 = arith.addf %151, %159 : vector<16x128xf32>
    %161 = vector.broadcast %157 : vector<1x128xf32> to vector<16x128xf32>
    %162 = arith.mulf %155, %161 : vector<16x128xf32>
    %163 = arith.addf %154, %162 : vector<16x128xf32>
    %c19 = arith.constant 19 : index
    %c0_79 = arith.constant 0 : index
    %164 = vector.load %arg1[%c19, %c0_79] : memref<20x128xf32, #tpu.memory_space<vmem>>, vector<1x128xf32>
    %c19_80 = arith.constant 19 : index
    %c0_81 = arith.constant 0 : index
    %165 = vector.load %arg2[%c19_80, %c0_81] : memref<20x128xf32, #tpu.memory_space<vmem>>, vector<1x128xf32>
    %166 = vector.broadcast %164 : vector<1x128xf32> to vector<16x128xf32>
    %167 = arith.mulf %130, %166 : vector<16x128xf32>
    %168 = arith.addf %160, %167 : vector<16x128xf32>
    %169 = vector.broadcast %165 : vector<1x128xf32> to vector<16x128xf32>
    %170 = arith.mulf %130, %169 : vector<16x128xf32>
    %171 = arith.addf %163, %170 : vector<16x128xf32>
    %172 = arith.addf %39, %82 : vector<16x128xf32>
    %173 = arith.addf %125, %168 : vector<16x128xf32>
    %174 = arith.addf %172, %173 : vector<16x128xf32>
    %c0_82 = arith.constant 0 : index
    %c0_83 = arith.constant 0 : index
    %175 = vector.load %arg3[%c0_82, %c0_83] : memref<1x128xf32, #tpu.memory_space<vmem>>, vector<1x128xf32>
    %176 = vector.broadcast %175 : vector<1x128xf32> to vector<16x128xf32>
    %177 = arith.addf %174, %176 : vector<16x128xf32>
    %178 = arith.addf %42, %85 : vector<16x128xf32>
    %179 = arith.addf %128, %171 : vector<16x128xf32>
    %180 = arith.addf %178, %179 : vector<16x128xf32>
    %c0_84 = arith.constant 0 : index
    %c0_85 = arith.constant 0 : index
    %181 = vector.load %arg4[%c0_84, %c0_85] : memref<1x128xf32, #tpu.memory_space<vmem>>, vector<1x128xf32>
    %182 = vector.broadcast %181 : vector<1x128xf32> to vector<16x128xf32>
    %183 = arith.addf %180, %182 : vector<16x128xf32>
    %184 = math.tanh %177 : vector<16x128xf32>
    %cst = arith.constant 0.000000e+00 : f32
    %185 = vector.broadcast %cst : f32 to vector<16x128xf32>
    %186 = arith.subf %185, %183 : vector<16x128xf32>
    %187 = math.exp %186 : vector<16x128xf32>
    %cst_86 = arith.constant 1.000000e+00 : f32
    %188 = vector.broadcast %cst_86 : f32 to vector<16x128xf32>
    %189 = arith.addf %188, %187 : vector<16x128xf32>
    %190 = tpu.reciprocal %189 : vector<16x128xf32> -> vector<16x128xf32>
    %191 = arith.mulf %184, %190 : vector<16x128xf32>
    %cst_87 = arith.constant dense<0.000000e+00> : vector<128xf32>
    %192 = vector.multi_reduction <add>, %191, %cst_87 [0] : vector<16x128xf32> to vector<128xf32>
    %193 = vector.shape_cast %192 : vector<128xf32> to vector<1x128xf32>
    %194 = arith.mulf %191, %191 : vector<16x128xf32>
    %cst_88 = arith.constant dense<0.000000e+00> : vector<128xf32>
    %195 = vector.multi_reduction <add>, %194, %cst_88 [0] : vector<16x128xf32> to vector<128xf32>
    %196 = vector.shape_cast %195 : vector<128xf32> to vector<1x128xf32>
    %c4_i32_89 = arith.constant 4 : i32
    %197 = tpu.dynamic_rotate %193 by %c4_i32_89 dim 1 : vector<1x128xf32>, i32 -> vector<1x128xf32>
    %198 = arith.addf %193, %197 : vector<1x128xf32>
    %c4_i32_90 = arith.constant 4 : i32
    %199 = tpu.dynamic_rotate %196 by %c4_i32_90 dim 1 : vector<1x128xf32>, i32 -> vector<1x128xf32>
    %200 = arith.addf %196, %199 : vector<1x128xf32>
    %c8_i32 = arith.constant 8 : i32
    %201 = tpu.dynamic_rotate %198 by %c8_i32 dim 1 : vector<1x128xf32>, i32 -> vector<1x128xf32>
    %202 = arith.addf %198, %201 : vector<1x128xf32>
    %c8_i32_91 = arith.constant 8 : i32
    %203 = tpu.dynamic_rotate %200 by %c8_i32_91 dim 1 : vector<1x128xf32>, i32 -> vector<1x128xf32>
    %204 = arith.addf %200, %203 : vector<1x128xf32>
    %c16_i32 = arith.constant 16 : i32
    %205 = tpu.dynamic_rotate %202 by %c16_i32 dim 1 : vector<1x128xf32>, i32 -> vector<1x128xf32>
    %206 = arith.addf %202, %205 : vector<1x128xf32>
    %c16_i32_92 = arith.constant 16 : i32
    %207 = tpu.dynamic_rotate %204 by %c16_i32_92 dim 1 : vector<1x128xf32>, i32 -> vector<1x128xf32>
    %208 = arith.addf %204, %207 : vector<1x128xf32>
    %c32_i32 = arith.constant 32 : i32
    %209 = tpu.dynamic_rotate %206 by %c32_i32 dim 1 : vector<1x128xf32>, i32 -> vector<1x128xf32>
    %210 = arith.addf %206, %209 : vector<1x128xf32>
    %c32_i32_93 = arith.constant 32 : i32
    %211 = tpu.dynamic_rotate %208 by %c32_i32_93 dim 1 : vector<1x128xf32>, i32 -> vector<1x128xf32>
    %212 = arith.addf %208, %211 : vector<1x128xf32>
    %c64_i32 = arith.constant 64 : i32
    %213 = tpu.dynamic_rotate %210 by %c64_i32 dim 1 : vector<1x128xf32>, i32 -> vector<1x128xf32>
    %214 = arith.addf %210, %213 : vector<1x128xf32>
    %c64_i32_94 = arith.constant 64 : i32
    %215 = tpu.dynamic_rotate %212 by %c64_i32_94 dim 1 : vector<1x128xf32>, i32 -> vector<1x128xf32>
    %216 = arith.addf %212, %215 : vector<1x128xf32>
    %cst_95 = arith.constant 0.001953125 : f32
    %217 = vector.broadcast %cst_95 : f32 to vector<1x128xf32>
    %218 = arith.mulf %214, %217 : vector<1x128xf32>
    %cst_96 = arith.constant 0.001953125 : f32
    %219 = vector.broadcast %cst_96 : f32 to vector<1x128xf32>
    %220 = arith.mulf %216, %219 : vector<1x128xf32>
    %221 = arith.mulf %218, %218 : vector<1x128xf32>
    %222 = arith.subf %220, %221 : vector<1x128xf32>
    %cst_97 = arith.constant 9.99999974E-6 : f32
    %223 = vector.broadcast %cst_97 : f32 to vector<1x128xf32>
    %224 = arith.addf %222, %223 : vector<1x128xf32>
    %225 = math.rsqrt %224 : vector<1x128xf32>
    %c0_98 = arith.constant 0 : index
    %c0_99 = arith.constant 0 : index
    %226 = vector.load %arg5[%c0_98, %c0_99] : memref<16x128xf32, #tpu.memory_space<vmem>>, vector<16x128xf32>
    %227 = vector.broadcast %218 : vector<1x128xf32> to vector<16x128xf32>
    %228 = arith.subf %191, %227 : vector<16x128xf32>
    %229 = vector.broadcast %225 : vector<1x128xf32> to vector<16x128xf32>
    %230 = arith.mulf %228, %229 : vector<16x128xf32>
    %231 = arith.addf %226, %230 : vector<16x128xf32>
    %c0_100 = arith.constant 0 : index
    %c0_101 = arith.constant 0 : index
    %232 = vector.load %arg6[%c0_100, %c0_101] : memref<16x128xf32, #tpu.memory_space<vmem>>, vector<16x128xf32>
    tpu.vector_store %arg6[%c0_100, %c0_101], %231 {strides = array<i32>} : memref<16x128xf32, #tpu.memory_space<vmem>>, vector<16x128xf32>,
    return
  }
}

</mosaic_0001>

<bundles_post_ra>
// kernel: mul.41
= control target key start
LH: loop header
LB: loop body
LE: loop exit
PB: predicated region body
PF: predicated region fallthrough
CT: control target
= control target key end

     0   :  { %s210_s0 = inlined_call_operand.vmem [shape: f32[8,4,3,3], index: 0, kind: input, shape index: {}]   ;;  %s211_s1 = inlined_call_operand.vmem [shape: f32[8,4,3,3], index: 1, kind: input, shape index: {}]   ;;  %s212_s2 = inlined_call_operand.vmem [shape: f32[8,4,3,3], index: 2, kind: output, shape index: {}]  }
   0x1   :  { %v3_v0 = vld [vmem:[%s210_s0] sm:$0xf]  ;;  %v90_v2 = vld [vmem:[%s210_s0 + $0xc] sm:$0xf]  ;;  %v93_v5 = vld [vmem:[%s210_s0 + $0x18] sm:$0xf] }
   0x2   :  { %v4_v1 = vld [vmem:[%s211_s1] sm:$0xf]  ;;  %v91_v4 = vld [vmem:[%s211_s1 + $0xc] sm:$0xf]  ;;  %v94_v6 = vld [vmem:[%s211_s1 + $0x18] sm:$0xf] }
   0x3   :  { %v7_v3 = vmul.f32 %v4_v1, %v3_v0  ;;  %v16_v7 = vmul.f32 %v91_v4, %v90_v2  ;;  %v26_v8 = vmul.f32 %v94_v6, %v93_v5  ;;  %v96_v9 = vld [vmem:[%s210_s0 + $0x4] sm:$0xf]  ;;  %v99_v11 = vld [vmem:[%s210_s0 + $0x10] sm:$0xf]  ;;  %v102_v14 = vld [vmem:[%s210_s0 + $0x1c] sm:$0xf] }
   0x4   :  { %v97_v10 = vld [vmem:[%s211_s1 + $0x4] sm:$0xf]  ;;  %v100_v13 = vld [vmem:[%s211_s1 + $0x10] sm:$0xf]  ;;  %v103_v15 = vld [vmem:[%s211_s1 + $0x1c] sm:$0xf] }
   0x5   :  { %9 = vst [vmem:[%s212_s2] sm:$0xf] %v7_v3  ;;  %v36_v12 = vmul.f32 %v97_v10, %v96_v9  ;;  %92 = vst [vmem:[%s212_s2 + $0xc] sm:$0xf] %v16_v7  ;;  %v46_v16 = vmul.f32 %v100_v13, %v99_v11  ;;  %v56_v17 = vmul.f32 %v103_v15, %v102_v14  ;;  %v105_v18 = vld [vmem:[%s210_s0 + $0x8] sm:$0xf] }
   0x6   :  { %95 = vst [vmem:[%s212_s2 + $0x18] sm:$0xf] %v26_v8  ;;  %v106_v19 = vld [vmem:[%s211_s1 + $0x8] sm:$0xf]  ;;  %v108_v20 = vld [vmem:[%s210_s0 + $0x14] sm:$0xf] }
   0x7   :  { %98 = vst [vmem:[%s212_s2 + $0x4] sm:$0xf] %v36_v12  ;;  %v66_v21 = vmul.f32 %v106_v19, %v105_v18  ;;  %v109_v22 = vld [vmem:[%s211_s1 + $0x14] sm:$0xf]  ;;  %v111_v23 = vld [vmem:[%s210_s0 + $0x20] sm:$0xf] }
   0x8   :  { %v112_v24 = vld [vmem:[%s211_s1 + $0x20] sm:$0xf]  ;;  %101 = vst [vmem:[%s212_s2 + $0x10] sm:$0xf] %v46_v16  ;;  %104 = vst [vmem:[%s212_s2 + $0x1c] sm:$0xf] %v56_v17  ;;  %v76_v25 = vmul.f32 %v109_v22, %v108_v20 }
   0x9   :  { %v86_v26 = vmul.f32 %v112_v24, %v111_v23  ;;  %107 = vst [vmem:[%s212_s2 + $0x8] sm:$0xf] %v66_v21 }
   0xa   :  { %110 = vst [vmem:[%s212_s2 + $0x14] sm:$0xf] %v76_v25 }
   0xb   :  { %113 = vst [vmem:[%s212_s2 + $0x20] sm:$0xf] %v86_v26 }

// kernel: gated_res_block.1
= control target key start
LH: loop header
LB: loop body
LE: loop exit
PB: predicated region body
PF: predicated region fallthrough
CT: control target
= control target key end

     0   :  { %s611_s25 = smov 4   ;;  %s612_s14 = smov 124   ;;  %s980_s0 = inlined_call_operand.vmem [shape: f32[68,128], index: 0, kind: input, shape index: {}]   ;;  %s981_s1 = inlined_call_operand.vmem [shape: f32[20,128], index: 1, kind: input, shape index: {}]   ;;  %s982_s2 = inlined_call_operand.vmem [shape: f32[20,128], index: 2, kind: input, shape index: {}]   ;;  %s983_s4 = inlined_call_operand.vmem [shape: f32[1,128], index: 4, kind: input, shape index: {}]   ;;  %s984_s3 = inlined_call_operand.vmem [shape: f32[1,128], index: 3, kind: input, shape index: {}]   ;;  %s985_s5 = inlined_call_operand.vmem [shape: f32[16,128], index: 5, kind: input, shape index: {}]   ;;  %s986_s6 = inlined_call_operand.vmem [shape: f32[16,128], index: 6, kind: output, shape index: {}]  }
   0x1   :  { %v655_v0 = vld [vmem:[%s980_s0 + $0x11] sm:$0xff]  ;;  %v660_v1 = vld [vmem:[%s980_s0] sm:$0xff]  ;;  %v674_v3 = vld [vmem:[%s980_s0 + $0x8] sm:$0xff]  ;;  %s615_s17 = smov 32  }
   0x2   :  { %129 = vrot.lane.b32.xlu1 %v655_v0, %s611_s25  ;;  %27 = vrot.lane.b32.xlu0 %v660_v1, %s611_s25  ;;  %v669_v2 = vld [vmem:[%s980_s0 + $0x19] sm:$0xff]  ;;  %v683_v4 = vld [vmem:[%s980_s0 + $0x2a] sm:$0xff] }
   0x3   :  { %v688_v5 = vld [vmem:[%s980_s0 + $0x22] sm:$0xff]  ;;  %v702_v7 = vld [vmem:[%s980_s0 + $0x33] sm:$0xff]  ;;  %v230_v12 = vld [vmem:[%s980_s0 + $0x2b] sm:$0xff] }
   0x4   :  { %v697_v6 = vld [vmem:[%s980_s0 + $0x3b] sm:$0xff]  ;;  %v26_v8 = vld [vmem:[%s980_s0 + $0x9] sm:$0xff]  ;;  %v127_v11 = vld [vmem:[%s980_s0 + $0x12] sm:$0xff] }
   0x5   :  { %v25_v9 = vld [vmem:[%s980_s0 + $0x1] sm:$0xff]  ;;  %v331_v15 = vld [vmem:[%s980_s0 + $0x34] sm:$0xff]  ;;  %v567_v24 = vld [vmem:[%s981_s1 + $0x9] ss:$0 sm:$0xff] }
   0x6   :  { %131 = vrot.lane.b32.xlu1 %v669_v2, %s611_s25  ;;  %29 = vrot.lane.b32.xlu0 %v674_v3, %s611_s25  ;;  %v128_v10 = vld [vmem:[%s980_s0 + $0x1a] sm:$0xff]  ;;  %v229_v13 = vld [vmem:[%s980_s0 + $0x23] sm:$0xff]  ;;  %v792_v38 = vmul.f32 %v567_v24, %v127_v11 }
   0x7   :  { %v332_v14 = vld [vmem:[%s980_s0 + $0x3c] sm:$0xff]  ;;  %v557_v22 = vld [vmem:[%s981_s1 + $0x4] ss:$0 sm:$0xff]  ;;  %v568_v25 = vld [vmem:[%s982_s2 + $0x9] ss:$0 sm:$0xff]  ;;  %v788_v36 = vmul.f32 %v567_v24, %v128_v10 }
   0x8   :  { %v558_v23 = vld [vmem:[%s982_s2 + $0x4] ss:$0 sm:$0xff]  ;;  %v577_v26 = vld [vmem:[%s981_s1 + $0xe] ss:$0 sm:$0xff]  ;;  %v770_v28 = vmul.f32 %v557_v22, %v26_v8  ;;  %v774_v30 = vmul.f32 %v557_v22, %v25_v9  ;;  %v587_v32 = vld [vmem:[%s981_s1 + $0x13] ss:$0 sm:$0xff]  ;;  %v790_v37 = vmul.f32 %v568_v25, %v128_v10  ;;  %v794_v39 = vmul.f32 %v568_v25, %v127_v11 }
   0x9   :  { %v578_v27 = vld [vmem:[%s982_s2 + $0xe] ss:$0 sm:$0xff]  ;;  %v772_v29 = vmul.f32 %v558_v23, %v26_v8  ;;  %v776_v31 = vmul.f32 %v558_v23, %v25_v9  ;;  %v588_v33 = vld [vmem:[%s982_s2 + $0x13] ss:$0 sm:$0xff]  ;;  %v561_v40 = vld [vmem:[%s981_s1 + $0x6] ss:$0 sm:$0xff]  ;;  %v802_v42 = vmul.f32 %v577_v26, %v230_v12  ;;  %v806_v44 = vmul.f32 %v577_v26, %v229_v13 }
   0xa   :  { %233 = vrot.lane.b32.xlu1 %v683_v4, %s611_s25  ;;  %231 = vrot.lane.b32.xlu0 %v688_v5, %s611_s25  ;;  %v562_v41 = vld [vmem:[%s982_s2 + $0x6] ss:$0 sm:$0xff]  ;;  %v804_v43 = vmul.f32 %v578_v27, %v230_v12  ;;  %v808_v45 = vmul.f32 %v578_v27, %v229_v13  ;;  %v559_v46 = vld [vmem:[%s981_s1 + $0x5] ss:$0 sm:$0xff]  ;;  %v819_v49 = vmul.f32 %v587_v32, %v332_v14 }
   0xb   :  { %987 = vst [vmem:[#allocation2_spill] sm:$0xff] %v806_v44  ;;  %v551_v47 = vld [vmem:[%s981_s1 + $0x1] ss:$0 sm:$0xff]  ;;  %v821_v50 = vmul.f32 %v588_v33, %v332_v14  ;;  %v823_v51 = vmul.f32 %v587_v32, %v331_v15  ;;  %v825_v52 = vmul.f32 %v588_v33, %v331_v15  ;;  %v560_v53 = vld [vmem:[%s982_s2 + $0x5] ss:$0 sm:$0xff]  ;;  %v153_v56 = vmul.f32 %v561_v40, %v655_v0 }
   0xc   :  { %988 = vst [vmem:[#allocation3_spill] sm:$0xff] %v808_v45  ;;  %v552_v48 = vld [vmem:[%s982_s2 + $0x1] ss:$0 sm:$0xff]  ;;  %989 = vst [vmem:[#allocation4_spill] sm:$0xff] %v819_v49  ;;  %v549_v54 = vld [vmem:[%s981_s1] ss:$0 sm:$0xff]  ;;  %v161_v57 = vmul.f32 %v562_v41, %v655_v0  ;;  %v154_v58 = vmul.f32 %v561_v40, %v669_v2  ;;  %v162_v59 = vmul.f32 %v562_v41, %v669_v2 }
   0xd   :  { %990 = vst [vmem:[#allocation5_spill] sm:$0xff] %v821_v50  ;;  %991 = vst [vmem:[#allocation6_spill] sm:$0xff] %v823_v51  ;;  %v550_v55 = vld [vmem:[%s982_s2] ss:$0 sm:$0xff]  ;;  %v51_v62 = vmul.f32 %v551_v47, %v660_v1  ;;  %v59_v63 = vmul.f32 %v552_v48, %v660_v1  ;;  %v569_v32 = vld [vmem:[%s981_s1 + $0xa] ss:$0 sm:$0xff] }
   0xe   :  { %335 = vrot.lane.b32.xlu1 %v697_v6, %s611_s25  ;;  %333 = vrot.lane.b32.xlu0 %v702_v7, %s611_s25  ;;  %992 = vst [vmem:[#allocation7_spill] sm:$0xff] %v825_v52 }
  0x12   :  { %65 = vrot.lane.b32.xlu1 %v674_v3, %s612_s14  ;;  %63 = vrot.lane.b32.xlu0 %v660_v1, %s612_s14  ;;  %v581_v1 = vld [vmem:[%s981_s1 + $0x10] ss:$0 sm:$0xff] }
  0x16   :  { %167 = vrot.lane.b32.xlu1 %v669_v2, %s612_s14  ;;  %165 = vrot.lane.b32.xlu0 %v655_v0, %s612_s14  ;;  %v572_v0 = vld [vmem:[%s982_s2 + $0xb] ss:$0 sm:$0xff] }
  0x17   :  { %v264_v25 = vmul.f32 %v572_v0, %v683_v4 }
  0x1a   :  { %269 = vrot.lane.b32.xlu1 %v683_v4, %s612_s14  ;;  %267 = vrot.lane.b32.xlu0 %v688_v5, %s612_s14 }
  0x1e   :  { %371 = vrot.lane.b32.xlu1 %v697_v6, %s612_s14  ;;  %369 = vrot.lane.b32.xlu0 %v702_v7, %s612_s14 }
  0x22   :  { %87 = vrot.lane.b32.xlu1 %v26_v8, %s611_s25  ;;  %85 = vrot.lane.b32.xlu0 %v25_v9, %s611_s25  ;;  %v52_v8 = vmul.f32 %v551_v47, %v674_v3  ;;  %v60_v9 = vmul.f32 %v552_v48, %v674_v3  ;;  %v582_v3 = vld [vmem:[%s982_s2 + $0x10] ss:$0 sm:$0xff]  ;;  %v579_v48 = vld [vmem:[%s981_s1 + $0xf] ss:$0 sm:$0xff] }
  0x23   :  { %v366_v33 = vmul.f32 %v582_v3, %v697_v6  ;;  %v365_v40 = vmul.f32 %v582_v3, %v702_v7 }
  0x26   :  { %189 = vrot.lane.b32.xlu1 %v128_v10, %s611_s25  ;;  %187 = vrot.lane.b32.xlu0 %v127_v11, %s611_s25  ;;  %v571_v10 = vld [vmem:[%s981_s1 + $0xb] ss:$0 sm:$0xff] }
  0x27   :  { %v256_v24 = vmul.f32 %v571_v10, %v683_v4  ;;  %v357_v4 = vmul.f32 %v581_v1, %v702_v7  ;;  %v553_v7 = vld [vmem:[%s981_s1 + $0x2] ss:$0 sm:$0xff] }
  0x2a   :  { %291 = vrot.lane.b32.xlu1 %v230_v12, %s611_s25  ;;  %289 = vrot.lane.b32.xlu0 %v229_v13, %s611_s25 }
  0x2e   :  { %393 = vrot.lane.b32.xlu1 %v332_v14, %s611_s25  ;;  %391 = vrot.lane.b32.xlu0 %v331_v15, %s611_s25 }
  0x74   :  { %v130_v16 = vpop.permute.xlu1 %129  ;;  %v28_v17 = vpop.permute.xlu0 %27 }
  0x75   :  { %v139_v11 = vmul.f32 %v559_v46, %v130_v16  ;;  %v145_v2 = vmul.f32 %v560_v53, %v130_v16  ;;  %v37_v12 = vmul.f32 %v549_v54, %v28_v17  ;;  %v43_v13 = vmul.f32 %v550_v55, %v28_v17 }
  0x76   :  { %v255_v16 = vmul.f32 %v571_v10, %v688_v5  ;;  %v263_v17 = vmul.f32 %v572_v0, %v688_v5 }
  0x77   :  { %v155_v41 = vadd.f32 %v153_v56, %v139_v11  ;;  %v163_v5 = vadd.f32 %v161_v57, %v145_v2  ;;  %v61_v47 = vadd.f32 %v59_v63, %v43_v13  ;;  %v554_v56 = vld [vmem:[%s982_s2 + $0x2] ss:$0 sm:$0xff] }
  0x78   :  { %v132_v18 = vpop.permute.xlu1 %131  ;;  %v30_v19 = vpop.permute.xlu0 %29 }
  0x79   :  { %v140_v14 = vmul.f32 %v559_v46, %v132_v18  ;;  %v146_v15 = vmul.f32 %v560_v53, %v132_v18  ;;  %v38_v22 = vmul.f32 %v549_v54, %v30_v19  ;;  %v44_v23 = vmul.f32 %v550_v55, %v30_v19  ;;  %v570_v18 = vld [vmem:[%s982_s2 + $0xa] ss:$0 sm:$0xff]  ;;  %v580_v53 = vld [vmem:[%s982_s2 + $0xf] ss:$0 sm:$0xff] }
  0x7a   :  { %v358_v19 = vmul.f32 %v581_v1, %v697_v6  ;;  %v53_v46 = vadd.f32 %v51_v62, %v37_v12 }
  0x7b   :  { %v156_v54 = vadd.f32 %v154_v58, %v140_v14  ;;  %v164_v55 = vadd.f32 %v162_v59, %v146_v15  ;;  %v54_v10 = vadd.f32 %v52_v8, %v38_v22  ;;  %v62_v6 = vadd.f32 %v60_v9, %v44_v23  ;;  %v563_v58 = vld [vmem:[%s981_s1 + $0x7] ss:$0 sm:$0xff] }
  0x7c   :  { %v748_v20 = vpop.permute.xlu1 %233  ;;  %v750_v21 = vpop.permute.xlu0 %231  ;;  %v564_v59 = vld [vmem:[%s982_s2 + $0x7] ss:$0 sm:$0xff] }
  0x7d   :  { %v242_v57 = vmul.f32 %v569_v32, %v748_v20  ;;  %v248_v62 = vmul.f32 %v570_v18, %v748_v20  ;;  %v241_v63 = vmul.f32 %v569_v32, %v750_v21  ;;  %v247_v0 = vmul.f32 %v570_v18, %v750_v21 }
  0x7f   :  { %v258_v32 = vadd.f32 %v256_v24, %v242_v57  ;;  %v266_v18 = vadd.f32 %v264_v25, %v248_v62  ;;  %v257_v52 = vadd.f32 %v255_v16, %v241_v63  ;;  %v265_v51 = vadd.f32 %v263_v17, %v247_v0  ;;  %v555_v16 = vld [vmem:[%s981_s1 + $0x3] ss:$0 sm:$0xff] }
  0x80   :  { %v784_v34 = vpop.permute.xlu1 %335  ;;  %v786_v35 = vpop.permute.xlu0 %333  ;;  %v556_v17 = vld [vmem:[%s982_s2 + $0x3] ss:$0 sm:$0xff] }
  0x81   :  { %v344_v11 = vmul.f32 %v579_v48, %v784_v34  ;;  %v350_v2 = vmul.f32 %v580_v53, %v784_v34  ;;  %v343_v20 = vmul.f32 %v579_v48, %v786_v35  ;;  %v349_v12 = vmul.f32 %v580_v53, %v786_v35  ;;  %v573_v35 = vld [vmem:[%s981_s1 + $0xc] ss:$0 sm:$0xff] }
  0x83   :  { %v360_v45 = vadd.f32 %v358_v19, %v344_v11  ;;  %v368_v34 = vadd.f32 %v366_v33, %v350_v2  ;;  %v359_v44 = vadd.f32 %v357_v4, %v343_v20  ;;  %v367_v48 = vadd.f32 %v365_v40, %v349_v12  ;;  %v583_v40 = vld [vmem:[%s981_s1 + $0x11] ss:$0 sm:$0xff] }
  0x84   :  { %v66_v60 = vpop.permute.xlu1 %65  ;;  %v64_v61 = vpop.permute.xlu0 %63 }
  0x85   :  { %v74_v13 = vmul.f32 %v553_v7, %v66_v60  ;;  %v82_v21 = vmul.f32 %v554_v56, %v66_v60  ;;  %v73_v1 = vmul.f32 %v553_v7, %v64_v61  ;;  %v81_v3 = vmul.f32 %v554_v56, %v64_v61  ;;  %v574_v60 = vld [vmem:[%s982_s2 + $0xc] ss:$0 sm:$0xff] }
  0x87   :  { %v76_v61 = vadd.f32 %v74_v13, %v54_v10  ;;  %v75_v24 = vadd.f32 %v73_v1, %v53_v46  ;;  %v83_v25 = vadd.f32 %v81_v3, %v61_v47  ;;  %v584_v46 = vld [vmem:[%s982_s2 + $0x11] ss:$0 sm:$0xff] }
  0x88   :  { %v168_v26 = vpop.permute.xlu1 %167  ;;  %v166_v27 = vpop.permute.xlu0 %165 }
  0x89   :  { %v176_v14 = vmul.f32 %v563_v58, %v168_v26  ;;  %v184_v15 = vmul.f32 %v564_v59, %v168_v26  ;;  %v175_v22 = vmul.f32 %v563_v58, %v166_v27  ;;  %v183_v23 = vmul.f32 %v564_v59, %v166_v27 }
  0x8a   :  { %v84_v26 = vadd.f32 %v82_v21, %v62_v6 }
  0x8b   :  { %v178_v27 = vadd.f32 %v176_v14, %v156_v54  ;;  %v186_v19 = vadd.f32 %v184_v15, %v164_v55  ;;  %v177_v33 = vadd.f32 %v175_v22, %v155_v41  ;;  %v185_v4 = vadd.f32 %v183_v23, %v163_v5 }
  0x8c   :  { %v270_v8 = vpop.permute.xlu1 %269  ;;  %v268_v9 = vpop.permute.xlu0 %267 }
  0x8d   :  { %v278_v47 = vmul.f32 %v573_v35, %v270_v8  ;;  %v286_v53 = vmul.f32 %v574_v60, %v270_v8  ;;  %v277_v10 = vmul.f32 %v573_v35, %v268_v9  ;;  %v285_v6 = vmul.f32 %v574_v60, %v268_v9  ;;  %v565_v8 = vld [vmem:[%s981_s1 + $0x8] ss:$0 sm:$0xff] }
  0x8e   :  { %v566_v9 = vld [vmem:[%s982_s2 + $0x8] ss:$0 sm:$0xff] }
  0x8f   :  { %v280_v20 = vadd.f32 %v278_v47, %v258_v32  ;;  %v288_v12 = vadd.f32 %v286_v53, %v266_v18  ;;  %v279_v13 = vadd.f32 %v277_v10, %v257_v52  ;;  %v287_v21 = vadd.f32 %v285_v6, %v265_v51  ;;  %v575_v32 = vld [vmem:[%s981_s1 + $0xd] ss:$0 sm:$0xff] }
  0x90   :  { %v372_v50 = vpop.permute.xlu1 %371  ;;  %v370_v49 = vpop.permute.xlu0 %369  ;;  %v576_v51 = vld [vmem:[%s982_s2 + $0xd] ss:$0 sm:$0xff] }
  0x91   :  { %v380_v41 = vmul.f32 %v583_v40, %v372_v50  ;;  %v388_v5 = vmul.f32 %v584_v46, %v372_v50  ;;  %v379_v63 = vmul.f32 %v583_v40, %v370_v49  ;;  %v387_v0 = vmul.f32 %v584_v46, %v370_v49 }
  0x93   :  { %v382_v52 = vadd.f32 %v380_v41, %v360_v45  ;;  %v381_v18 = vadd.f32 %v379_v63, %v359_v44 }
  0x94   :  { %v88_v7 = vpop.permute.xlu1 %87  ;;  %v86_v56 = vpop.permute.xlu0 %85 }
  0x95   :  { %v96_v57 = vmul.f32 %v555_v16, %v88_v7  ;;  %v104_v62 = vmul.f32 %v556_v17, %v88_v7  ;;  %v95_v54 = vmul.f32 %v555_v16, %v86_v56  ;;  %v103_v55 = vmul.f32 %v556_v17, %v86_v56 }
  0x97   :  { %v98_v58 = vadd.f32 %v96_v57, %v76_v61  ;;  %v106_v59 = vadd.f32 %v104_v62, %v84_v26  ;;  %v97_v11 = vadd.f32 %v95_v54, %v75_v24  ;;  %v105_v2 = vadd.f32 %v103_v55, %v83_v25  ;;  %v993_v57 = vld [vmem:[#allocation2_spill] sm:$0xff]  ;;  %v994_v54 = vld [vmem:[#allocation3_spill] sm:$0xff] }
  0x98   :  { %v190_v1 = vpop.permute.xlu1 %189  ;;  %v188_v50 = vpop.permute.xlu0 %187 }
  0x99   :  { %v116_v49 = vadd.f32 %v770_v28, %v98_v58  ;;  %v124_v3 = vadd.f32 %v772_v29, %v106_v59  ;;  %v115_v14 = vadd.f32 %v774_v30, %v97_v11  ;;  %v123_v15 = vadd.f32 %v776_v31, %v105_v2 }
  0x9a   :  { %v198_v22 = vmul.f32 %v565_v8, %v190_v1  ;;  %v206_v23 = vmul.f32 %v566_v9, %v190_v1  ;;  %v197_v35 = vmul.f32 %v565_v8, %v188_v50  ;;  %v205_v60 = vmul.f32 %v566_v9, %v188_v50  ;;  %v995_v8 = vld [vmem:[#allocation4_spill] sm:$0xff] }
  0x9b   :  { %v390_v28 = vadd.f32 %v388_v5, %v368_v34  ;;  %v389_v29 = vadd.f32 %v387_v0, %v367_v48 }
  0x9c   :  { %v200_v61 = vadd.f32 %v198_v22, %v178_v27  ;;  %v208_v30 = vadd.f32 %v206_v23, %v186_v19  ;;  %v199_v26 = vadd.f32 %v197_v35, %v177_v33  ;;  %v207_v31 = vadd.f32 %v205_v60, %v185_v4  ;;  %v292_v24 = vpop.permute.xlu1 %291  ;;  %v290_v25 = vpop.permute.xlu0 %289  ;;  %v585_v19 = vld [vmem:[%s981_s1 + $0x12] ss:$0 sm:$0xff] }
  0x9d   :  { %v300_v16 = vmul.f32 %v575_v32, %v292_v24  ;;  %v308_v17 = vmul.f32 %v576_v51, %v292_v24  ;;  %v299_v40 = vmul.f32 %v575_v32, %v290_v25  ;;  %v307_v46 = vmul.f32 %v576_v51, %v290_v25  ;;  %v586_v33 = vld [vmem:[%s982_s2 + $0x12] ss:$0 sm:$0xff] }
  0x9e   :  { %v218_v47 = vadd.f32 %v788_v36, %v200_v61  ;;  %v226_v53 = vadd.f32 %v790_v37, %v208_v30  ;;  %v217_v10 = vadd.f32 %v792_v38, %v199_v26  ;;  %v225_v45 = vadd.f32 %v794_v39, %v207_v31 }
  0x9f   :  { %v302_v44 = vadd.f32 %v300_v16, %v280_v20  ;;  %v310_v34 = vadd.f32 %v308_v17, %v288_v12  ;;  %v301_v48 = vadd.f32 %v299_v40, %v279_v13  ;;  %v309_v27 = vadd.f32 %v307_v46, %v287_v21  ;;  %v996_v20 = vld [vmem:[#allocation5_spill] sm:$0xff]  ;;  %v997_v13 = vld [vmem:[#allocation6_spill] sm:$0xff]  ;;  %v998_v21 = vld [vmem:[#allocation7_spill] sm:$0xff] }
  0xa0   :  { %v432_v4 = vadd.f32 %v218_v47, %v116_v49  ;;  %v447_v36 = vadd.f32 %v226_v53, %v124_v3  ;;  %v431_v6 = vadd.f32 %v217_v10, %v115_v14  ;;  %v446_v37 = vadd.f32 %v225_v45, %v123_v15  ;;  %v394_v7 = vpop.permute.xlu1 %393  ;;  %v392_v38 = vpop.permute.xlu0 %391  ;;  %v590_v14 = vld [vmem:[%s983_s4] ss:$0 sm:$0xff]  ;;  %s614_s4 = smov 16  }
  0xa1   :  { %v320_v39 = vadd.f32 %v802_v42, %v302_v44  ;;  %v328_v56 = vadd.f32 %v804_v43, %v310_v34  ;;  %v319_v62 = vadd.f32 %v993_v57, %v301_v48  ;;  %v327_v55 = vadd.f32 %v994_v54, %v309_v27 }
  0xa2   :  { %v402_v41 = vmul.f32 %v585_v19, %v394_v7  ;;  %v410_v5 = vmul.f32 %v586_v33, %v394_v7  ;;  %v401_v63 = vmul.f32 %v585_v19, %v392_v38  ;;  %v409_v0 = vmul.f32 %v586_v33, %v392_v38 }
  0xa4   :  { %v404_v58 = vadd.f32 %v402_v41, %v382_v52  ;;  %v412_v59 = vadd.f32 %v410_v5, %v390_v28  ;;  %v403_v11 = vadd.f32 %v401_v63, %v381_v18  ;;  %v411_v2 = vadd.f32 %v409_v0, %v389_v29  ;;  %v589_v29 = vld [vmem:[%s984_s3] ss:$0 sm:$0xff]  ;;  %s613_s3 = smov 8  }
  0xa6   :  { %v422_v9 = vadd.f32 %v995_v8, %v404_v58  ;;  %v430_v12 = vadd.f32 %v996_v20, %v412_v59  ;;  %v421_v42 = vadd.f32 %v997_v13, %v403_v11  ;;  %v429_v43 = vadd.f32 %v998_v21, %v411_v2 }
  0xa8   :  { %v434_v1 = vadd.f32 %v422_v9, %v320_v39  ;;  %v449_v50 = vadd.f32 %v430_v12, %v328_v56  ;;  %v433_v49 = vadd.f32 %v421_v42, %v319_v62  ;;  %v448_v3 = vadd.f32 %v429_v43, %v327_v55 }
  0xaa   :  { %v436_v15 = vadd.f32 %v434_v1, %v432_v4  ;;  %v451_v22 = vadd.f32 %v449_v50, %v447_v36  ;;  %v435_v23 = vadd.f32 %v433_v49, %v431_v6  ;;  %v450_v35 = vadd.f32 %v448_v3, %v446_v37 }
  0xab   :  { %v529_v3 = vlaneseq }
  0xac   :  { %v460_v60 = vadd.f32 %v590_v14, %v451_v22  ;;  %v459_v32 = vadd.f32 %v590_v14, %v450_v35  ;;  %v445_v61 = vadd.f32 %v589_v29, %v436_v15  ;;  %v444_v30 = vadd.f32 %v589_v29, %v435_v23 }
  0xad   :  { %v530_v22 = vshrl.u32 %v529_v3, 7 }
  0xae   :  { %v464_v51 = vsub.f32 0.0, %v460_v60  ;;  %v463_v52 = vsub.f32 0.0, %v459_v32 }
  0xaf   :  { %v531_v23 = vsub.s32 0, %v530_v22 }
  0xb0   :  { %v467_v28 = vmul.f32 1.442695, %v464_v51  ;;  %v465_v18 = vmul.f32 1.442695, %v463_v52 }
  0xb2   :  { %597 = vpow2.f32 %v467_v28  ;;  %v527_v28 = vld [vmem:[%s985_s5] sm:$0xff] }
  0xb3   :  { %599 = vpow2.f32 %v465_v18  ;;  %v528_v18 = vld [vmem:[%s985_s5 + $0x8] sm:$0xff] }
  0xb4   :  { %601 = vtanh.f32 %v445_v61 }
  0xb5   :  { %603 = vtanh.f32 %v444_v30 }
  0xbc   :  { %v598_v26 = vpop.eup %597 }
  0xbd   :  { %v600_v31 = vpop.eup %599  ;;  %v470_v24 = vadd.f32 1.0, %v598_v26 }
  0xbe   :  { %v469_v25 = vadd.f32 1.0, %v600_v31  ;;  %v602_v16 = vpop.eup %601 }
  0xbf   :  { %605 = vrcp.f32 %v470_v24  ;;  %v604_v17 = vpop.eup %603 }
  0xc0   :  { %607 = vrcp.f32 %v469_v25 }
  0xc9   :  { %v606_v40 = vpop.eup %605 }
  0xca   :  { %v608_v46 = vpop.eup %607  ;;  %v954_v47 = vmul.f32 %v606_v40, %v602_v16 }
  0xcb   :  { %v956_v53 = vmul.f32 %v608_v46, %v604_v17 }
  0xcc   :  { %v483_v10 = vmul.f32 %v954_v47, %v954_v47 }
  0xcd   :  { %v475_v45 = vadd.f32 %v954_v47, %v956_v53  ;;  %v482_v44 = vmul.f32 %v956_v53, %v956_v53 }
  0xcf   :  { %v476_v34 = vrot.slane %v475_v45, 4  ;;  %v484_v48 = vadd.f32 %v483_v10, %v482_v44 }
  0xd1   :  { %v477_v27 = vadd.f32 %v476_v34, %v475_v45  ;;  %v485_v19 = vrot.slane %v484_v48, 4 }
  0xd3   :  { %v478_v33 = vrot.slane %v477_v27, 2  ;;  %v486_v4 = vadd.f32 %v485_v19, %v484_v48 }
  0xd5   :  { %v479_v36 = vadd.f32 %v478_v33, %v477_v27  ;;  %v487_v6 = vrot.slane %v486_v4, 2 }
  0xd7   :  { %v480_v37 = vrot.slane %v479_v36, 1  ;;  %v488_v7 = vadd.f32 %v487_v6, %v486_v4 }
  0xd9   :  { %v481_v38 = vadd.f32 %v480_v37, %v479_v36  ;;  %v489_v39 = vrot.slane %v488_v7, 1 }
  0xdb   :  { %491 = vrot.lane.b32.xlu0 %v481_v38, %s611_s25  ;;  %v490_v56 = vadd.f32 %v489_v39, %v488_v7 }
  0xdd   :  { %494 = vrot.lane.b32.xlu1 %v490_v56, %s611_s25  ;;  %s616_s25 = smov 64  }
 0x14d   :  { %v492_v57 = vpop.permute.xlu0 %491 }
 0x14e   :  { %v493_v62 = vadd.f32 %v492_v57, %v481_v38 }
 0x14f   :  { %v495_v54 = vpop.permute.xlu1 %494 }
 0x150   :  { %v496_v55 = vadd.f32 %v495_v54, %v490_v56  ;;  %497 = vrot.lane.b32.xlu0 %v493_v62, %s613_s3 }
 0x152   :  { %500 = vrot.lane.b32.xlu1 %v496_v55, %s613_s3 }
 0x1c2   :  { %v498_v41 = vpop.permute.xlu0 %497 }
 0x1c3   :  { %v499_v5 = vadd.f32 %v498_v41, %v493_v62 }
 0x1c4   :  { %v501_v63 = vpop.permute.xlu1 %500 }
 0x1c5   :  { %v502_v0 = vadd.f32 %v501_v63, %v496_v55  ;;  %503 = vrot.lane.b32.xlu0 %v499_v5, %s614_s4 }
 0x1c7   :  { %506 = vrot.lane.b32.xlu1 %v502_v0, %s614_s4 }
 0x237   :  { %v504_v58 = vpop.permute.xlu0 %503 }
 0x238   :  { %v505_v59 = vadd.f32 %v504_v58, %v499_v5 }
 0x239   :  { %v507_v11 = vpop.permute.xlu1 %506 }
 0x23a   :  { %v508_v2 = vadd.f32 %v507_v11, %v502_v0  ;;  %509 = vrot.lane.b32.xlu0 %v505_v59, %s615_s17 }
 0x23c   :  { %512 = vrot.lane.b32.xlu1 %v508_v2, %s615_s17 }
 0x2ac   :  { %v510_v8 = vpop.permute.xlu0 %509 }
 0x2ad   :  { %v511_v9 = vadd.f32 %v510_v8, %v505_v59 }
 0x2ae   :  { %v513_v20 = vpop.permute.xlu1 %512 }
 0x2af   :  { %v514_v12 = vadd.f32 %v513_v20, %v508_v2  ;;  %515 = vrot.lane.b32.xlu0 %v511_v9, %s616_s25 }
 0x2b1   :  { %518 = vrot.lane.b32.xlu1 %v514_v12, %s616_s25 }
 0x321   :  { %v516_v13 = vpop.permute.xlu0 %515 }
 0x322   :  { %v517_v42 = vadd.f32 %v516_v13, %v511_v9 }
 0x323   :  { %v519_v21 = vpop.permute.xlu1 %518 }
 0x324   :  { %v521_v43 = vmul.f32 0.001953125, %v517_v42  ;;  %v520_v1 = vadd.f32 %v519_v21, %v514_v12 }
 0x326   :  { %v523_v50 = vmul.f32 %v521_v43, %v521_v43  ;;  %v522_v49 = vmul.f32 0.001953125, %v520_v1  ;;  %v532_v35 = vrot.slane %v521_v43, %v531_v23 }
 0x328   :  { %v524_v14 = vsub.f32 %v522_v49, %v523_v50  ;;  %v533_v32 = vsub.f32 %v956_v53, %v532_v35  ;;  %v534_v51 = vsub.f32 %v954_v47, %v532_v35 }
 0x32a   :  { %v525_v15 = vadd.f32 1e-05, %v524_v14 }
 0x32c   :  { %609 = vrsqrt.f32 %v525_v15 }
 0x336   :  { %v610_v60 = vpop.eup %609 }
 0x337   :  { %v538_v52 = vrot.slane %v610_v60, %v531_v23 }
 0x339   :  { %v539_v29 = vmul.f32 %v538_v52, %v533_v32  ;;  %v540_v61 = vmul.f32 %v538_v52, %v534_v51 }
 0x33b   :  { %v541_v30 = vadd.f32 %v539_v29, %v527_v28  ;;  %v542_v26 = vadd.f32 %v540_v61, %v528_v18 }
 0x33d   :  { %543 = vst [vmem:[%s986_s6] sm:$0xff] %v541_v30  ;;  %544 = vst [vmem:[%s986_s6 + $0x8] sm:$0xff] %v542_v26 }

</bundles_post_ra>
